<compile_context>
chip_gen: v5e
topology: v5e:2x2
jax: 0.10.0
libtpu: 0.0.40
codegen_flags: <defaults>
</compile_context>

<pallas_src>
import numpy as np
import jax
import jax.numpy as jnp
from jax import lax
from jax.experimental import pallas as pl
from jax.experimental.pallas import tpu as pltpu

EPS = 1e-5  # nn.BatchNorm2d default eps


def _make_kernel(N, H, W, C, mm_dtype):
    NH = N * H
    WC = W * C
    inv_cnt = 1.0 / float(N * H * W)

    def lane_channel_sum(row):
        """row: (1, WC).  Sum over the W width positions of each channel via a
        cyclic roll-and-add tree (shifts are multiples of C, so channel slots
        stay aligned; summing the full cyclic orbit makes the roll direction
        irrelevant).  Result is the per-channel total tiled across all W."""
        s = row
        k = 1
        while k < W:                      # unrolled at trace time, log2(W) steps
            s = s + pltpu.roll(s, shift=k * C, axis=1)   # XLU lane rotation
            k *= 2
        return s

    def kernel(x_ref, wk_ref, bn_ref, mask_ref, out_ref):
        # x_ref   : (N*H, W*C) f32   input rows (lane-dense NHWC row view)
        # wk_ref  : (6, W*C, W*C)    folded conv matrices [conv*3 + kh], mm_dtype
        # bn_ref  : (4, W*C)  f32    gamma1, beta1, gamma2, beta2 (tiled to lanes)
        # mask_ref: (2, N*H, 1) f32  vertical border masks (h > 0, h < H-1)
        # out_ref : (N*H, W*C) f32
        xr = x_ref[...]                          # (NH, WC) f32
        mask_up = mask_ref[0]                    # (NH, 1)
        mask_dn = mask_ref[1]                    # (NH, 1)
        zrow = jnp.zeros((1, WC), jnp.float32)

        def conv3x3(y, base):
            """3x3 SAME conv: vertical taps via sublane shift + border mask
            (VPU/XLU), horizontal taps + channel mixing folded into three
            lane-dense MXU matmuls, accumulated as one chained sum."""
            up = jnp.concatenate([zrow, y[:NH - 1, :]], axis=0) * mask_up
            dn = jnp.concatenate([y[1:, :], zrow], axis=0) * mask_dn
            return (jnp.dot(up.astype(mm_dtype), wk_ref[base + 0],
                            preferred_element_type=jnp.float32)
                    + jnp.dot(y.astype(mm_dtype), wk_ref[base + 1],
                              preferred_element_type=jnp.float32)
                    + jnp.dot(dn.astype(mm_dtype), wk_ref[base + 2],
                              preferred_element_type=jnp.float32))

        def bn_train(y, idx):
            """Train-mode BN with two-pass (subtract-mean) variance.  The
            reductions are a sublane sum + the lane roll tree — no MXU work."""
            colsum = jnp.sum(y, axis=0, keepdims=True)            # (1, WC)
            mean_row = lane_channel_sum(colsum) * inv_cnt         # per-channel mean
            d = y - mean_row
            colsq = jnp.sum(d * d, axis=0, keepdims=True)         # (1, WC)
            var_row = lane_channel_sum(colsq) * inv_cnt           # biased variance
            gamma = bn_ref[2 * idx:2 * idx + 1, :]                # (1, WC)
            beta = bn_ref[2 * idx + 1:2 * idx + 2, :]             # (1, WC)
            scale = gamma * lax.rsqrt(var_row + EPS)              # EUP rsqrt
            return d * scale + beta

        y = conv3x3(xr, 0)
        y = jnp.maximum(bn_train(y, 0), 0.0)
        y = conv3x3(y, 3)
        y = bn_train(y, 1)
        out_ref[...] = jnp.maximum(y + xr, 0.0).astype(out_ref.dtype)

    return kernel


def other_block_pallas(x_nchw, params, *, matmul_dtype=jnp.bfloat16):
    """x_nchw: (N, C, H, W) fp32.  params: dict of conv/bn parameters.
    matmul_dtype: MXU operand dtype (bf16 default -> native on v6e/v7x;
    pass jnp.float32 for an exact-math path).

    NOTE: implements the module's *training-mode* forward (BatchNorm uses
    batch statistics); the conv biases are intentionally not passed to the
    kernel because batch-mean subtraction cancels them exactly.  Do NOT reuse
    this kernel for eval-mode / running-stats BN without restoring them."""
    N, C, H, W = x_nchw.shape
    NH, WC = N * H, W * C
    assert W & (W - 1) == 0, "BN lane roll tree assumes power-of-two W"

    # Lane-dense row view of the input (NHWC flattened per image row).
    x_rows = jnp.transpose(x_nchw, (0, 2, 3, 1)).reshape(NH, WC).astype(jnp.float32)

    def conv_to_row_matmuls(w_oihw):
        """Fold the 3 horizontal taps + channel mixing of one kernel row kh
        into a (W*C, W*C) block-tridiagonal matrix (3 matrices per conv)."""
        wt = jnp.transpose(w_oihw, (2, 3, 1, 0))              # (kh,kw,Cin,Cout) HWIO
        kw_i = jnp.arange(3)[:, None, None]
        v_i = jnp.arange(W)[None, :, None]
        w_i = jnp.arange(W)[None, None, :]
        m2 = (v_i == w_i + kw_i - 1).astype(wt.dtype)         # (3, W, W)
        wk = jnp.einsum('hkio,kvw->hviwo', wt, m2)            # (3, W, Cin, W, Cout)
        return wk.reshape(3, WC, WC)

    wk = jnp.concatenate([conv_to_row_matmuls(params["w1"]),
                          conv_to_row_matmuls(params["w2"])],
                         axis=0).astype(matmul_dtype)          # (6, WC, WC)

    # gamma/beta broadcast to lane width once in the wrapper.
    bn_rows = jnp.stack([jnp.tile(params["g1"], W), jnp.tile(params["be1"], W),
                         jnp.tile(params["g2"], W), jnp.tile(params["be2"], W)]
                        ).astype(jnp.float32)                  # (4, WC)

    # Vertical border masks (hoisted out of the kernel per review).
    hh = jnp.arange(NH, dtype=jnp.int32) % H
    masks = jnp.stack([(hh > 0), (hh < H - 1)]).astype(jnp.float32)
    masks = masks.reshape(2, NH, 1)                            # (2, NH, 1)

    kernel = _make_kernel(N, H, W, C, matmul_dtype)

    itemsize = jnp.dtype(matmul_dtype).itemsize
    flops = 2 * 6 * NH * WC * WC                               # six MXU matmuls
    bytes_accessed = (2 * NH * WC * 4          # input rows + output rows
                      + 6 * WC * WC * itemsize  # folded conv weights
                      + 4 * WC * 4              # gamma/beta rows
                      + 2 * NH * 4)             # border masks

    vmem = pl.BlockSpec(memory_space=pltpu.MemorySpace.VMEM)
    out_rows = pl.pallas_call(
        kernel,
        out_shape=jax.ShapeDtypeStruct((NH, WC), jnp.float32),
        in_specs=[vmem, vmem, vmem, vmem],
        out_specs=vmem,
        cost_estimate=pl.CostEstimate(flops=flops,
                                      transcendentals=2 * WC,
                                      bytes_accessed=bytes_accessed),
    )(x_rows, wk, bn_rows, masks)

    return jnp.transpose(out_rows.reshape(N, H, W, C), (0, 3, 1, 2))  # back to NCHW


# --------------------------- pure-JAX reference -------------------------------
def other_block_ref(x_nchw, params):
    x = jnp.transpose(x_nchw, (0, 2, 3, 1))
    C = x.shape[-1]

    def conv(x, w, b):
        wt = jnp.transpose(w, (2, 3, 1, 0))  # HWIO
        y = lax.conv_general_dilated(
            x, wt, (1, 1), "SAME",
            dimension_numbers=("NHWC", "HWIO", "NHWC"))
        return y + b.reshape(1, 1, 1, C)

    def bn(y, g, be):
        mean = jnp.mean(y, axis=(0, 1, 2), keepdims=True)
        var = jnp.mean((y - mean) ** 2, axis=(0, 1, 2), keepdims=True)
        return (g.reshape(1, 1, 1, C) * (y - mean) / jnp.sqrt(var + EPS)
                + be.reshape(1, 1, 1, C))

    identity = x
    y = jax.nn.relu(bn(conv(x, params["w1"], params["b1"]),
                       params["g1"], params["be1"]))
    y = bn(conv(y, params["w2"], params["b2"]), params["g2"], params["be2"])
    y = jax.nn.relu(y + identity)
    return jnp.transpose(y, (0, 3, 1, 2))


if __name__ == "__main__":
    # Residual add requires in_channels == out_channels; W*C = 128 -> lane-dense.
    N, C, H, W = 2, 8, 16, 16

    key = jax.random.PRNGKey(0)
    ks = jax.random.split(key, 9)
    params = {
        "w1": jax.random.normal(ks[0], (C, C, 3, 3), jnp.float32) * 0.1,
        "b1": jax.random.normal(ks[1], (C,), jnp.float32) * 0.05,
        "g1": 1.0 + jax.random.normal(ks[2], (C,), jnp.float32) * 0.05,
        "be1": jax.random.normal(ks[3], (C,), jnp.float32) * 0.05,
        "w2": jax.random.normal(ks[4], (C, C, 3, 3), jnp.float32) * 0.1,
        "b2": jax.random.normal(ks[5], (C,), jnp.float32) * 0.05,
        "g2": 1.0 + jax.random.normal(ks[6], (C,), jnp.float32) * 0.05,
        "be2": jax.random.normal(ks[7], (C,), jnp.float32) * 0.05,
    }
    x = jax.random.normal(ks[8], (N, C, H, W), jnp.float32)

    ref = jax.block_until_ready(other_block_ref(x, params))

    # Exact-math path (f32 MXU operands).
    out_f32 = jax.block_until_ready(
        other_block_pallas(x, params, matmul_dtype=jnp.float32))
    assert out_f32.shape == (N, C, H, W)
    np.testing.assert_allclose(np.asarray(out_f32), np.asarray(ref),
                               atol=1e-2, rtol=1e-2)

    # Production path (bf16 MXU operands, f32 accumulation -> looser tolerance).
    out_bf16 = jax.block_until_ready(other_block_pallas(x, params))
    np.testing.assert_allclose(np.asarray(out_bf16), np.asarray(ref),
                               atol=5e-2, rtol=5e-2)

    print("KERNEL_OK")
</pallas_src>

<mosaic_0001>
module attributes {stable_mosaic.version = 11 : i64} {
  func.func @kernel(%arg0: memref<32x128xf32, #tpu.memory_space<vmem>>, %arg1: memref<6x128x128xf32, #tpu.memory_space<vmem>>, %arg2: memref<4x128xf32, #tpu.memory_space<vmem>>, %arg3: memref<2x32x1xf32, #tpu.memory_space<vmem>>, %arg4: memref<32x128xf32, #tpu.memory_space<vmem>>) attributes {dimension_semantics = [], scalar_prefetch = 0 : i64, scratch_operands = 0 : i64, tpu.core_type = #tpu.core_type<tc>} {
    %c0 = arith.constant 0 : index
    %c0_0 = arith.constant 0 : index
    %0 = vector.load %arg0[%c0, %c0_0] : memref<32x128xf32, #tpu.memory_space<vmem>>, vector<32x128xf32>
    %c0_1 = arith.constant 0 : index
    %c0_2 = arith.constant 0 : index
    %c0_3 = arith.constant 0 : index
    %1 = vector.load %arg3[%c0_1, %c0_2, %c0_3] : memref<2x32x1xf32, #tpu.memory_space<vmem>>, vector<1x32x1xf32>
    %2 = vector.shape_cast %1 : vector<1x32x1xf32> to vector<32x1xf32>
    %c1 = arith.constant 1 : index
    %c0_4 = arith.constant 0 : index
    %c0_5 = arith.constant 0 : index
    %3 = vector.load %arg3[%c1, %c0_4, %c0_5] : memref<2x32x1xf32, #tpu.memory_space<vmem>>, vector<1x32x1xf32>
    %4 = vector.shape_cast %3 : vector<1x32x1xf32> to vector<32x1xf32>
    %cst = arith.constant 0.000000e+00 : f32
    %5 = vector.broadcast %cst : f32 to vector<1x128xf32>
    %6 = vector.extract_strided_slice %0 {offsets = [0, 0], sizes = [31, 128], strides = [1, 1]} : vector<32x128xf32> to vector<31x128xf32>
    %7 = tpu.concatenate %5, %6 in 0 : vector<1x128xf32>, vector<31x128xf32> -> vector<32x128xf32>
    %8 = vector.broadcast %2 : vector<32x1xf32> to vector<32x128xf32>
    %9 = arith.mulf %7, %8 : vector<32x128xf32>
    %10 = vector.extract_strided_slice %0 {offsets = [1, 0], sizes = [31, 128], strides = [1, 1]} : vector<32x128xf32> to vector<31x128xf32>
    %11 = tpu.concatenate %10, %5 in 0 : vector<31x128xf32>, vector<1x128xf32> -> vector<32x128xf32>
    %12 = vector.broadcast %4 : vector<32x1xf32> to vector<32x128xf32>
    %13 = arith.mulf %11, %12 : vector<32x128xf32>
    %c0_6 = arith.constant 0 : index
    %c0_7 = arith.constant 0 : index
    %c0_8 = arith.constant 0 : index
    %14 = vector.load %arg1[%c0_6, %c0_7, %c0_8] : memref<6x128x128xf32, #tpu.memory_space<vmem>>, vector<1x128x128xf32>
    %15 = vector.shape_cast %14 : vector<1x128x128xf32> to vector<128x128xf32>
    %cst_9 = arith.constant dense<0.000000e+00> : vector<32x128xf32>
    %16 = tpu.matmul %9, %15, %cst_9 {dimension_numbers = #tpu.dot_dimension_numbers<[1], [0], [0], [1], [0, 0, 1, 1], [], []>} : vector<32x128xf32>, vector<128x128xf32>, vector<32x128xf32> -> vector<32x128xf32>
    %c1_10 = arith.constant 1 : index
    %c0_11 = arith.constant 0 : index
    %c0_12 = arith.constant 0 : index
    %17 = vector.load %arg1[%c1_10, %c0_11, %c0_12] : memref<6x128x128xf32, #tpu.memory_space<vmem>>, vector<1x128x128xf32>
    %18 = vector.shape_cast %17 : vector<1x128x128xf32> to vector<128x128xf32>
    %cst_13 = arith.constant dense<0.000000e+00> : vector<32x128xf32>
    %19 = tpu.matmul %0, %18, %cst_13 {dimension_numbers = #tpu.dot_dimension_numbers<[1], [0], [0], [1], [0, 0, 1, 1], [], []>} : vector<32x128xf32>, vector<128x128xf32>, vector<32x128xf32> -> vector<32x128xf32>
    %20 = arith.addf %16, %19 : vector<32x128xf32>
    %c2 = arith.constant 2 : index
    %c0_14 = arith.constant 0 : index
    %c0_15 = arith.constant 0 : index
    %21 = vector.load %arg1[%c2, %c0_14, %c0_15] : memref<6x128x128xf32, #tpu.memory_space<vmem>>, vector<1x128x128xf32>
    %22 = vector.shape_cast %21 : vector<1x128x128xf32> to vector<128x128xf32>
    %cst_16 = arith.constant dense<0.000000e+00> : vector<32x128xf32>
    %23 = tpu.matmul %13, %22, %cst_16 {dimension_numbers = #tpu.dot_dimension_numbers<[1], [0], [0], [1], [0, 0, 1, 1], [], []>} : vector<32x128xf32>, vector<128x128xf32>, vector<32x128xf32> -> vector<32x128xf32>
    %24 = arith.addf %20, %23 : vector<32x128xf32>
    %cst_17 = arith.constant dense<0.000000e+00> : vector<128xf32>
    %25 = vector.multi_reduction <add>, %24, %cst_17 [0] : vector<32x128xf32> to vector<128xf32>
    %26 = vector.shape_cast %25 : vector<128xf32> to vector<1x128xf32>
    %c8_i32 = arith.constant 8 : i32
    %27 = tpu.dynamic_rotate %26 by %c8_i32 dim 1 : vector<1x128xf32>, i32 -> vector<1x128xf32>
    %28 = arith.addf %26, %27 : vector<1x128xf32>
    %c16_i32 = arith.constant 16 : i32
    %29 = tpu.dynamic_rotate %28 by %c16_i32 dim 1 : vector<1x128xf32>, i32 -> vector<1x128xf32>
    %30 = arith.addf %28, %29 : vector<1x128xf32>
    %c32_i32 = arith.constant 32 : i32
    %31 = tpu.dynamic_rotate %30 by %c32_i32 dim 1 : vector<1x128xf32>, i32 -> vector<1x128xf32>
    %32 = arith.addf %30, %31 : vector<1x128xf32>
    %c64_i32 = arith.constant 64 : i32
    %33 = tpu.dynamic_rotate %32 by %c64_i32 dim 1 : vector<1x128xf32>, i32 -> vector<1x128xf32>
    %34 = arith.addf %32, %33 : vector<1x128xf32>
    %cst_18 = arith.constant 0.001953125 : f32
    %35 = vector.broadcast %cst_18 : f32 to vector<1x128xf32>
    %36 = arith.mulf %34, %35 : vector<1x128xf32>
    %37 = vector.broadcast %36 : vector<1x128xf32> to vector<32x128xf32>
    %38 = arith.subf %24, %37 : vector<32x128xf32>
    %39 = arith.mulf %38, %38 : vector<32x128xf32>
    %cst_19 = arith.constant dense<0.000000e+00> : vector<128xf32>
    %40 = vector.multi_reduction <add>, %39, %cst_19 [0] : vector<32x128xf32> to vector<128xf32>
    %41 = vector.shape_cast %40 : vector<128xf32> to vector<1x128xf32>
    %c8_i32_20 = arith.constant 8 : i32
    %42 = tpu.dynamic_rotate %41 by %c8_i32_20 dim 1 : vector<1x128xf32>, i32 -> vector<1x128xf32>
    %43 = arith.addf %41, %42 : vector<1x128xf32>
    %c16_i32_21 = arith.constant 16 : i32
    %44 = tpu.dynamic_rotate %43 by %c16_i32_21 dim 1 : vector<1x128xf32>, i32 -> vector<1x128xf32>
    %45 = arith.addf %43, %44 : vector<1x128xf32>
    %c32_i32_22 = arith.constant 32 : i32
    %46 = tpu.dynamic_rotate %45 by %c32_i32_22 dim 1 : vector<1x128xf32>, i32 -> vector<1x128xf32>
    %47 = arith.addf %45, %46 : vector<1x128xf32>
    %c64_i32_23 = arith.constant 64 : i32
    %48 = tpu.dynamic_rotate %47 by %c64_i32_23 dim 1 : vector<1x128xf32>, i32 -> vector<1x128xf32>
    %49 = arith.addf %47, %48 : vector<1x128xf32>
    %cst_24 = arith.constant 0.001953125 : f32
    %50 = vector.broadcast %cst_24 : f32 to vector<1x128xf32>
    %51 = arith.mulf %49, %50 : vector<1x128xf32>
    %c0_25 = arith.constant 0 : index
    %c0_26 = arith.constant 0 : index
    %52 = vector.load %arg2[%c0_25, %c0_26] : memref<4x128xf32, #tpu.memory_space<vmem>>, vector<1x128xf32>
    %c1_27 = arith.constant 1 : index
    %c0_28 = arith.constant 0 : index
    %53 = vector.load %arg2[%c1_27, %c0_28] : memref<4x128xf32, #tpu.memory_space<vmem>>, vector<1x128xf32>
    %cst_29 = arith.constant 9.99999974E-6 : f32
    %54 = vector.broadcast %cst_29 : f32 to vector<1x128xf32>
    %55 = arith.addf %51, %54 : vector<1x128xf32>
    %56 = math.rsqrt %55 : vector<1x128xf32>
    %57 = arith.mulf %52, %56 : vector<1x128xf32>
    %58 = vector.broadcast %57 : vector<1x128xf32> to vector<32x128xf32>
    %59 = arith.mulf %38, %58 : vector<32x128xf32>
    %60 = vector.broadcast %53 : vector<1x128xf32> to vector<32x128xf32>
    %61 = arith.addf %59, %60 : vector<32x128xf32>
    %cst_30 = arith.constant 0.000000e+00 : f32
    %62 = vector.broadcast %cst_30 : f32 to vector<32x128xf32>
    %63 = arith.maximumf %61, %62 : vector<32x128xf32>
    %64 = vector.extract_strided_slice %63 {offsets = [0, 0], sizes = [31, 128], strides = [1, 1]} : vector<32x128xf32> to vector<31x128xf32>
    %65 = tpu.concatenate %5, %64 in 0 : vector<1x128xf32>, vector<31x128xf32> -> vector<32x128xf32>
    %66 = vector.broadcast %2 : vector<32x1xf32> to vector<32x128xf32>
    %67 = arith.mulf %65, %66 : vector<32x128xf32>
    %68 = vector.extract_strided_slice %63 {offsets = [1, 0], sizes = [31, 128], strides = [1, 1]} : vector<32x128xf32> to vector<31x128xf32>
    %69 = tpu.concatenate %68, %5 in 0 : vector<31x128xf32>, vector<1x128xf32> -> vector<32x128xf32>
    %70 = vector.broadcast %4 : vector<32x1xf32> to vector<32x128xf32>
    %71 = arith.mulf %69, %70 : vector<32x128xf32>
    %c3 = arith.constant 3 : index
    %c0_31 = arith.constant 0 : index
    %c0_32 = arith.constant 0 : index
    %72 = vector.load %arg1[%c3, %c0_31, %c0_32] : memref<6x128x128xf32, #tpu.memory_space<vmem>>, vector<1x128x128xf32>
    %73 = vector.shape_cast %72 : vector<1x128x128xf32> to vector<128x128xf32>
    %cst_33 = arith.constant dense<0.000000e+00> : vector<32x128xf32>
    %74 = tpu.matmul %67, %73, %cst_33 {dimension_numbers = #tpu.dot_dimension_numbers<[1], [0], [0], [1], [0, 0, 1, 1], [], []>} : vector<32x128xf32>, vector<128x128xf32>, vector<32x128xf32> -> vector<32x128xf32>
    %c4 = arith.constant 4 : index
    %c0_34 = arith.constant 0 : index
    %c0_35 = arith.constant 0 : index
    %75 = vector.load %arg1[%c4, %c0_34, %c0_35] : memref<6x128x128xf32, #tpu.memory_space<vmem>>, vector<1x128x128xf32>
    %76 = vector.shape_cast %75 : vector<1x128x128xf32> to vector<128x128xf32>
    %cst_36 = arith.constant dense<0.000000e+00> : vector<32x128xf32>
    %77 = tpu.matmul %63, %76, %cst_36 {dimension_numbers = #tpu.dot_dimension_numbers<[1], [0], [0], [1], [0, 0, 1, 1], [], []>} : vector<32x128xf32>, vector<128x128xf32>, vector<32x128xf32> -> vector<32x128xf32>
    %78 = arith.addf %74, %77 : vector<32x128xf32>
    %c5 = arith.constant 5 : index
    %c0_37 = arith.constant 0 : index
    %c0_38 = arith.constant 0 : index
    %79 = vector.load %arg1[%c5, %c0_37, %c0_38] : memref<6x128x128xf32, #tpu.memory_space<vmem>>, vector<1x128x128xf32>
    %80 = vector.shape_cast %79 : vector<1x128x128xf32> to vector<128x128xf32>
    %cst_39 = arith.constant dense<0.000000e+00> : vector<32x128xf32>
    %81 = tpu.matmul %71, %80, %cst_39 {dimension_numbers = #tpu.dot_dimension_numbers<[1], [0], [0], [1], [0, 0, 1, 1], [], []>} : vector<32x128xf32>, vector<128x128xf32>, vector<32x128xf32> -> vector<32x128xf32>
    %82 = arith.addf %78, %81 : vector<32x128xf32>
    %cst_40 = arith.constant dense<0.000000e+00> : vector<128xf32>
    %83 = vector.multi_reduction <add>, %82, %cst_40 [0] : vector<32x128xf32> to vector<128xf32>
    %84 = vector.shape_cast %83 : vector<128xf32> to vector<1x128xf32>
    %c8_i32_41 = arith.constant 8 : i32
    %85 = tpu.dynamic_rotate %84 by %c8_i32_41 dim 1 : vector<1x128xf32>, i32 -> vector<1x128xf32>
    %86 = arith.addf %84, %85 : vector<1x128xf32>
    %c16_i32_42 = arith.constant 16 : i32
    %87 = tpu.dynamic_rotate %86 by %c16_i32_42 dim 1 : vector<1x128xf32>, i32 -> vector<1x128xf32>
    %88 = arith.addf %86, %87 : vector<1x128xf32>
    %c32_i32_43 = arith.constant 32 : i32
    %89 = tpu.dynamic_rotate %88 by %c32_i32_43 dim 1 : vector<1x128xf32>, i32 -> vector<1x128xf32>
    %90 = arith.addf %88, %89 : vector<1x128xf32>
    %c64_i32_44 = arith.constant 64 : i32
    %91 = tpu.dynamic_rotate %90 by %c64_i32_44 dim 1 : vector<1x128xf32>, i32 -> vector<1x128xf32>
    %92 = arith.addf %90, %91 : vector<1x128xf32>
    %cst_45 = arith.constant 0.001953125 : f32
    %93 = vector.broadcast %cst_45 : f32 to vector<1x128xf32>
    %94 = arith.mulf %92, %93 : vector<1x128xf32>
    %95 = vector.broadcast %94 : vector<1x128xf32> to vector<32x128xf32>
    %96 = arith.subf %82, %95 : vector<32x128xf32>
    %97 = arith.mulf %96, %96 : vector<32x128xf32>
    %cst_46 = arith.constant dense<0.000000e+00> : vector<128xf32>
    %98 = vector.multi_reduction <add>, %97, %cst_46 [0] : vector<32x128xf32> to vector<128xf32>
    %99 = vector.shape_cast %98 : vector<128xf32> to vector<1x128xf32>
    %c8_i32_47 = arith.constant 8 : i32
    %100 = tpu.dynamic_rotate %99 by %c8_i32_47 dim 1 : vector<1x128xf32>, i32 -> vector<1x128xf32>
    %101 = arith.addf %99, %100 : vector<1x128xf32>
    %c16_i32_48 = arith.constant 16 : i32
    %102 = tpu.dynamic_rotate %101 by %c16_i32_48 dim 1 : vector<1x128xf32>, i32 -> vector<1x128xf32>
    %103 = arith.addf %101, %102 : vector<1x128xf32>
    %c32_i32_49 = arith.constant 32 : i32
    %104 = tpu.dynamic_rotate %103 by %c32_i32_49 dim 1 : vector<1x128xf32>, i32 -> vector<1x128xf32>
    %105 = arith.addf %103, %104 : vector<1x128xf32>
    %c64_i32_50 = arith.constant 64 : i32
    %106 = tpu.dynamic_rotate %105 by %c64_i32_50 dim 1 : vector<1x128xf32>, i32 -> vector<1x128xf32>
    %107 = arith.addf %105, %106 : vector<1x128xf32>
    %cst_51 = arith.constant 0.001953125 : f32
    %108 = vector.broadcast %cst_51 : f32 to vector<1x128xf32>
    %109 = arith.mulf %107, %108 : vector<1x128xf32>
    %c2_52 = arith.constant 2 : index
    %c0_53 = arith.constant 0 : index
    %110 = vector.load %arg2[%c2_52, %c0_53] : memref<4x128xf32, #tpu.memory_space<vmem>>, vector<1x128xf32>
    %c3_54 = arith.constant 3 : index
    %c0_55 = arith.constant 0 : index
    %111 = vector.load %arg2[%c3_54, %c0_55] : memref<4x128xf32, #tpu.memory_space<vmem>>, vector<1x128xf32>
    %cst_56 = arith.constant 9.99999974E-6 : f32
    %112 = vector.broadcast %cst_56 : f32 to vector<1x128xf32>
    %113 = arith.addf %109, %112 : vector<1x128xf32>
    %114 = math.rsqrt %113 : vector<1x128xf32>
    %115 = arith.mulf %110, %114 : vector<1x128xf32>
    %116 = vector.broadcast %115 : vector<1x128xf32> to vector<32x128xf32>
    %117 = arith.mulf %96, %116 : vector<32x128xf32>
    %118 = vector.broadcast %111 : vector<1x128xf32> to vector<32x128xf32>
    %119 = arith.addf %117, %118 : vector<32x128xf32>
    %120 = arith.addf %119, %0 : vector<32x128xf32>
    %cst_57 = arith.constant 0.000000e+00 : f32
    %121 = vector.broadcast %cst_57 : f32 to vector<32x128xf32>
    %122 = arith.maximumf %120, %121 : vector<32x128xf32>
    %c0_58 = arith.constant 0 : index
    %c0_59 = arith.constant 0 : index
    %123 = vector.load %arg4[%c0_58, %c0_59] : memref<32x128xf32, #tpu.memory_space<vmem>>, vector<32x128xf32>
    tpu.vector_store %arg4[%c0_58, %c0_59], %122 {strides = array<i32>} : memref<32x128xf32, #tpu.memory_space<vmem>>, vector<32x128xf32>,
    return
  }
}

</mosaic_0001>

<bundles_post_ra>
// kernel: tpu_custom_call.1
= control target key start
LH: loop header
LB: loop body
LE: loop exit
PB: predicated region body
PF: predicated region fallthrough
CT: control target
= control target key end

     0   :  { %9 = vsyncpa [#allocation3], 0  ;;  %s987_s0 = inlined_call_operand.vmem [shape: f32[32,128], index: 0, kind: input, shape index: {}]   ;;  %s988_s1 = inlined_call_operand.hbm [shape: f32[6,128,128], index: 1, kind: input, shape index: {}]   ;;  %s989_s2 = inlined_call_operand.vmem [shape: f32[4,128], index: 2, kind: input, shape index: {}]   ;;  %s990_s3 = inlined_call_operand.vmem [shape: f32[2,32,1], index: 3, kind: input, shape index: {}]   ;;  %s991_s4 = inlined_call_operand.hbm [shape: f32[32,128], index: 4, kind: output, shape index: {}]  }
   0x1   :  { %10 = vsyncpa [#allocation4], 0  ;;  %s17_s17 = sshll.u32 %s988_s1, 4  ;;  %s738_s18 = smov [#allocation2]   ;;  %s18_s17 = int_to_ptr.hbm [resolvable:$true] %s17_s17 }
   0x2   :  { %s19_s19 = sshll.u32 %s738_s18, 4  ;;  %s739_s20 = smov 128   ;;  %s20_s19 = int_to_ptr.vmem [resolvable:$true] %s19_s19 }
   0x3   :  { %s740_s21 = smov 8  }
   0x4   :  { %25 = dma.hbm_to_vmem [thread:$0]  %s18_s17, 12288, %s20_s19, [#allocation3], %s739_s20, %s739_s20, %s740_s21  }
   0x5   :  { %734 = dma.done.wait [#allocation3], 12288  }
   0x6   :  { %735 = vsyncadd [#allocation3], 4294955008  ;;  %v741_v0 = vmov 0   ;;  %v634_v1 = vld [vmem:[%s990_s3 + $0x28] sm:$0xff]  ;;  %v633_v2 = vld [vmem:[%s990_s3 + $0x20] sm:$0xff]  ;;  %vm88_vm0 = vcmask 1046528  }
   0x7   :  { %678 = vset.pattern.permute.xlu1 %v741_v0  ;;  %677 = vset.pattern.permute.xlu0 %v741_v0  ;;  %v635_v3 = vld [vmem:[%s990_s3 + $0x30] sm:$0xff]  ;;  %v232_v4 = vld [vmem:[#allocation2 + $0x178] sm:$0xff]  ;;  %v230_v6 = vld [vmem:[#allocation2 + $0x168] sm:$0xff]  ;;  %vm51_vm1 = vcmask 1040384   ;;  %s743_s18 = smov 32   ;;  %s744_s19 = smov 64  }
   0x8   :  { %679 = vset.pattern.permute.xlu2 %v741_v0  ;;  %108 = vperm.xlu1 %678, %v634_v1   ;;  %v231_v5 = vld [vmem:[#allocation2 + $0x170] sm:$0xff]  ;;  %v157_v7 = vld [vmem:[#allocation2 + $0xf8] sm:$0xff]  ;;  %v39_v11 = vld [vmem:[%s990_s3 + $0x8] sm:$0xff]  ;;  %s620_s6 = sshll.u32 %s991_s4, 4  ;;  %s621_s6 = int_to_ptr.hbm [resolvable:$true] %s620_s6 }
   0x9   :  { %103 = vperm.xlu0 %677, %v633_v2   ;;  %113 = vperm.xlu2 %679, %v635_v3   ;;  %v140_v8 = vld [vmem:[#allocation2 + $0x78] sm:$0xff]  ;;  %v156_v9 = vld [vmem:[#allocation2 + $0xf0] sm:$0xff]  ;;  %v38_v12 = vld [vmem:[%s990_s3] sm:$0xff] }
   0xa   :  { %233 = vmatpush.msra.mxu2 %v232_v4  ;;  %158 = vmatpush.msra.mxu0 %v157_v7  ;;  %v139_v10 = vld [vmem:[#allocation2 + $0x70] sm:$0xff]  ;;  %v229_v13 = vld [vmem:[#allocation2 + $0x160] sm:$0xff]  ;;  %v155_v14 = vld [vmem:[#allocation2 + $0xe8] sm:$0xff] }
   0xb   :  { %187 = vmatpush.msra.mxu1 %v140_v8  ;;  %v40_v15 = vld [vmem:[%s990_s3 + $0x10] sm:$0xff]  ;;  %v138_v16 = vld [vmem:[#allocation2 + $0x68] sm:$0xff]  ;;  %v228_v17 = vld [vmem:[#allocation2 + $0x158] sm:$0xff] }
   0xc   :  { %234 = vmatpush.msra.mxu2 %v231_v5  ;;  %159 = vmatpush.msra.mxu0 %v156_v9  ;;  %v154_v18 = vld [vmem:[#allocation2 + $0xe0] sm:$0xff]  ;;  %v227_v20 = vld [vmem:[#allocation2 + $0x150] sm:$0xff]  ;;  %v153_v21 = vld [vmem:[#allocation2 + $0xd8] sm:$0xff] }
   0xd   :  { %188 = vmatpush.msra.mxu1 %v139_v10  ;;  %v137_v19 = vld [vmem:[#allocation2 + $0x60] sm:$0xff]  ;;  %v136_v22 = vld [vmem:[#allocation2 + $0x58] sm:$0xff]  ;;  %v226_v23 = vld [vmem:[#allocation2 + $0x148] sm:$0xff] }
   0xe   :  { %235 = vmatpush.msra.mxu2 %v230_v6  ;;  %160 = vmatpush.msra.mxu0 %v155_v14  ;;  %v152_v24 = vld [vmem:[#allocation2 + $0xd0] sm:$0xff]  ;;  %v41_v25 = vld [vmem:[%s990_s3 + $0x18] sm:$0xff]  ;;  %v225_v27 = vld [vmem:[#allocation2 + $0x140] sm:$0xff] }
   0xf   :  { %189 = vmatpush.msra.mxu1 %v138_v16  ;;  %v636_v26 = vld [vmem:[%s990_s3 + $0x38] sm:$0xff]  ;;  %v135_v28 = vld [vmem:[#allocation2 + $0x50] sm:$0xff]  ;;  %v151_v29 = vld [vmem:[#allocation2 + $0xc8] sm:$0xff] }
  0x10   :  { %71 = vperm.xlu1 %678, %v39_v11   ;;  %236 = vmatpush.msra.mxu2 %v229_v13  ;;  %v224_v30 = vld [vmem:[#allocation2 + $0x138] sm:$0xff]  ;;  %v134_v31 = vld [vmem:[#allocation2 + $0x48] sm:$0xff]  ;;  %v150_v32 = vld [vmem:[#allocation2 + $0xc0] sm:$0xff] }
  0x11   :  { %66 = vperm.xlu0 %677, %v38_v12   ;;  %76 = vperm.xlu2 %679, %v40_v15   ;;  %v223_v33 = vld [vmem:[#allocation2 + $0x130] sm:$0xff]  ;;  %v133_v34 = vld [vmem:[#allocation2 + $0x40] sm:$0xff]  ;;  %v149_v35 = vld [vmem:[#allocation2 + $0xb8] sm:$0xff] }
  0x12   :  { %237 = vmatpush.msra.mxu2 %v228_v17  ;;  %161 = vmatpush.msra.mxu0 %v154_v18  ;;  %v222_v36 = vld [vmem:[#allocation2 + $0x128] sm:$0xff]  ;;  %v132_v37 = vld [vmem:[#allocation2 + $0x38] sm:$0xff]  ;;  %v148_v38 = vld [vmem:[#allocation2 + $0xb0] sm:$0xff] }
  0x13   :  { %190 = vmatpush.msra.mxu1 %v137_v19  ;;  %v221_v39 = vld [vmem:[#allocation2 + $0x120] sm:$0xff]  ;;  %v131_v40 = vld [vmem:[#allocation2 + $0x30] sm:$0xff]  ;;  %v147_v41 = vld [vmem:[#allocation2 + $0xa8] sm:$0xff] }
  0x14   :  { %238 = vmatpush.msra.mxu2 %v227_v20  ;;  %162 = vmatpush.msra.mxu0 %v153_v21  ;;  %v220_v42 = vld [vmem:[#allocation2 + $0x118] sm:$0xff]  ;;  %v130_v43 = vld [vmem:[#allocation2 + $0x28] sm:$0xff]  ;;  %v219_v44 = vld [vmem:[#allocation2 + $0x110] sm:$0xff] }
  0x15   :  { %191 = vmatpush.msra.mxu1 %v136_v22  ;;  %v218_v45 = vld [vmem:[#allocation2 + $0x108] sm:$0xff]  ;;  %v146_v46 = vld [vmem:[#allocation2 + $0xa0] sm:$0xff]  ;;  %v145_v49 = vld [vmem:[#allocation2 + $0x98] sm:$0xff] }
  0x16   :  { %239 = vmatpush.msra.mxu2 %v226_v23  ;;  %163 = vmatpush.msra.mxu0 %v152_v24  ;;  %v129_v47 = vld [vmem:[#allocation2 + $0x20] sm:$0xff]  ;;  %v128_v50 = vld [vmem:[#allocation2 + $0x18] sm:$0xff]  ;;  %v144_v51 = vld [vmem:[#allocation2 + $0x90] sm:$0xff] }
  0x17   :  { %192 = vmatpush.msra.mxu1 %v135_v28  ;;  %v217_v48 = vld [vmem:[#allocation2 + $0x100] sm:$0xff]  ;;  %v127_v52 = vld [vmem:[#allocation2 + $0x10] sm:$0xff]  ;;  %v143_v53 = vld [vmem:[#allocation2 + $0x88] sm:$0xff] }
  0x18   :  { %81 = vperm.xlu1 %678, %v41_v25   ;;  %240 = vmatpush.msra.mxu2 %v225_v27  ;;  %v126_v54 = vld [vmem:[#allocation2 + $0x8] sm:$0xff]  ;;  %v142_v55 = vld [vmem:[#allocation2 + $0x80] sm:$0xff]  ;;  %v818_v61 = vld [vmem:[%s987_s0 + $0x10] sm:$0xff] }
  0x19   :  { %118 = vperm.xlu0 %677, %v636_v26   ;;  %164 = vmatpush.msra.mxu0 %v151_v29  ;;  %v125_v56 = vld [vmem:[#allocation2] sm:$0xff]  ;;  %v810_v58 = vld [vmem:[%s987_s0 + $0x8] sm:$0xff]  ;;  %v92_v0 = vrot.slane %v818_v61, 1  ;;  %v830_v3 = vld [vmem:[%s987_s0 + $0x18] sm:$0xff]  ;;  %v55_v18 = vrot.slane %v818_v61, 7 }
  0x1a   :  { %241 = vmatpush.msra.mxu2 %v224_v30  ;;  %193 = vmatpush.msra.mxu1 %v134_v31  ;;  %v804_v57 = vld [vmem:[%s987_s0] sm:$0xff]  ;;  %v90_v60 = vrot.slane %v810_v58, 1  ;;  %v94_v9 = vrot.slane %v830_v3, 1  ;;  %v53_v11 = vrot.slane %v810_v58, 7  ;;  %v57_v25 = vrot.slane %v830_v3, 7  ;;  %s742_s0 = smov 16  }
  0x1b   :  { %165 = vmatpush.msra.mxu0 %v150_v32  ;;  %v89_v59 = vrot.slane %v804_v57, 1  ;;  %v52_v2 = vrot.slane %v804_v57, 7 }
  0x1c   :  { %242 = vmatpush.msra.mxu2 %v223_v33  ;;  %194 = vmatpush.msra.mxu1 %v133_v34  ;;  %v93_v5 = vsel %vm88_vm0, %v90_v60, %v92_v0  ;;  %v95_v13 = vsel %vm88_vm0, %v92_v0, %v94_v9  ;;  %v56_v21 = vsel %vm51_vm1, %v53_v11, %v55_v18  ;;  %v100_v22 = vsel %vm88_vm0, %v94_v9, 0.0 }
  0x1d   :  { %166 = vmatpush.msra.mxu0 %v149_v35  ;;  %v91_v62 = vsel %vm88_vm0, %v89_v59, %v90_v60  ;;  %v63_v6 = vsel %vm51_vm1, 0.0, %v52_v2  ;;  %v54_v15 = vsel %vm51_vm1, %v52_v2, %v53_v11  ;;  %v58_v27 = vsel %vm51_vm1, %v55_v18, %v57_v25 }
  0x1e   :  { %243 = vmatpush.msra.mxu2 %v222_v36  ;;  %195 = vmatpush.msra.mxu1 %v132_v37 }
  0x1f   :  { %167 = vmatpush.msra.mxu0 %v148_v38 }
  0x20   :  { %244 = vmatpush.msra.mxu2 %v221_v39  ;;  %196 = vmatpush.msra.mxu1 %v131_v40 }
  0x21   :  { %168 = vmatpush.msra.mxu0 %v147_v41 }
  0x22   :  { %245 = vmatpush.msra.mxu2 %v220_v42  ;;  %197 = vmatpush.msra.mxu1 %v130_v43 }
  0x23   :  { %169 = vmatpush.msra.mxu0 %v146_v46 }
  0x24   :  { %246 = vmatpush.msra.mxu2 %v219_v44  ;;  %198 = vmatpush.msra.mxu1 %v129_v47 }
  0x25   :  { %170 = vmatpush.msra.mxu0 %v145_v49 }
  0x26   :  { %247 = vmatpush.msra.mxu2 %v218_v45  ;;  %199 = vmatpush.msra.mxu1 %v128_v50 }
  0x27   :  { %171 = vmatpush.msra.mxu0 %v144_v51 }
  0x28   :  { %248 = vmatpush.msra.mxu2 %v217_v48  ;;  %200 = vmatpush.msra.mxu1 %v127_v52 }
  0x29   :  { %172 = vmatpush.msra.mxu0 %v143_v53 }
  0x2a   :  { %201 = vmatpush.msra.mxu1 %v126_v54 }
  0x2b   :  { %173 = vmatpush.msra.mxu0 %v142_v55 }
  0x2c   :  { %202 = vmatpush.msra.mxu1 %v125_v56  ;;  %174 = vmatmul.f32.vlgmr.msra.gmra.mxu0 %v804_v57 }
  0x34   :  { %177 = vmatmul.f32.gmra.mxu0 %v810_v58 }
  0x3c   :  { %180 = vmatmul.f32.gmra.mxu0 %v818_v61 }
  0x44   :  { %183 = vmatmul.f32.gmra.mxu0 %v830_v3 }
  0x63   :  { %v843_v12 = vpop.permute.xlu2 %113 }
  0x64   :  { %v123_v16 = vmul.f32 %v843_v12, %v95_v13 }
  0x6b   :  { %v852_v19 = vpop.permute.xlu2 %76 }
  0x6c   :  { %v86_v23 = vmul.f32 %v852_v19, %v56_v21 }
  0x7a   :  { %v833_v4 = vpop.permute.xlu1 %108 }
  0x7b   :  { %v822_v63 = vpop.permute.xlu0 %103  ;;  %v122_v7 = vmul.f32 %v833_v4, %v93_v5 }
  0x7c   :  { %v121_v1 = vmul.f32 %v822_v63, %v91_v62 }
  0x7e   :  { %249 = vmatmul.f32.vlgmr.msra.gmra.mxu2 %v121_v1 }
  0x82   :  { %v846_v14 = vpop.permute.xlu1 %71 }
  0x83   :  { %v838_v8 = vpop.permute.xlu0 %66  ;;  %v85_v17 = vmul.f32 %v846_v14, %v54_v15 }
  0x84   :  { %v84_v10 = vmul.f32 %v838_v8, %v63_v6 }
  0x86   :  { %203 = vmatmul.f32.vlgmr.msra.gmra.mxu1 %v84_v10  ;;  %252 = vmatmul.f32.gmra.mxu2 %v122_v7 }
  0x8a   :  { %v861_v26 = vpop.permute.xlu1 %81 }
  0x8b   :  { %v854_v20 = vpop.permute.xlu0 %118  ;;  %v87_v28 = vmul.f32 %v861_v26, %v58_v27 }
  0x8c   :  { %v124_v24 = vmul.f32 %v854_v20, %v100_v22 }
  0x8e   :  { %206 = vmatmul.f32.gmra.mxu1 %v85_v17  ;;  %255 = vmatmul.f32.gmra.mxu2 %v123_v16 }
  0x96   :  { %209 = vmatmul.f32.gmra.mxu1 %v86_v23  ;;  %258 = vmatmul.f32.gmra.mxu2 %v124_v24 }
  0x9e   :  { %212 = vmatmul.f32.gmra.mxu1 %v87_v28 }
  0xa9   :  { %v175_v29 = vpop.f32.mrf.mxu0 }
  0xb1   :  { %v178_v32 = vpop.f32.mrf.mxu0 }
  0xb9   :  { %v181_v35 = vpop.f32.mrf.mxu0 }
  0xc1   :  { %v184_v42 = vpop.f32.mrf.mxu0 }
 0x101   :  { %v250_v30 = vpop.f32.mrf.mxu2 }
 0x103   :  { %v204_v31 = vpop.f32.mrf.mxu1 }
 0x104   :  { %v205_v39 = vadd.f32 %v204_v31, %v175_v29 }
 0x106   :  { %v262_v43 = vadd.f32 %v250_v30, %v205_v39  ;;  %v416_v39 = vld [vmem:[#allocation2 + $0x278] sm:$0xff] }
 0x107   :  { %417 = vmatpush.msra.mxu3 %v416_v39  ;;  %v385_v39 = vld [vmem:[#allocation2 + $0x188] sm:$0xff] }
 0x109   :  { %v253_v33 = vpop.f32.mrf.mxu2 }
 0x10b   :  { %v207_v34 = vpop.f32.mrf.mxu1 }
 0x10c   :  { %v208_v38 = vadd.f32 %v207_v34, %v178_v32 }
 0x10e   :  { %v263_v41 = vadd.f32 %v253_v33, %v208_v38 }
 0x110   :  { %v266_v46 = vadd.f32 %v263_v41, %v262_v43 }
 0x111   :  { %v256_v36 = vpop.f32.mrf.mxu2 }
 0x113   :  { %v210_v37 = vpop.f32.mrf.mxu1 }
 0x114   :  { %v211_v40 = vadd.f32 %v210_v37, %v181_v35 }
 0x116   :  { %v264_v44 = vadd.f32 %v256_v36, %v211_v40  ;;  %v415_v40 = vld [vmem:[#allocation2 + $0x270] sm:$0xff] }
 0x117   :  { %418 = vmatpush.msra.mxu3 %v415_v40  ;;  %v477_v40 = vld [vmem:[#allocation2 + $0x288] sm:$0xff] }
 0x118   :  { %v267_v49 = vadd.f32 %v266_v46, %v264_v44  ;;  %v895_v46 = vld [vmem:[#allocation2 + $0x2f0] sm:$0xff] }
 0x119   :  { %v259_v48 = vpop.f32.mrf.mxu2 }
 0x11b   :  { %v213_v45 = vpop.f32.mrf.mxu1 }
 0x11c   :  { %v214_v47 = vadd.f32 %v213_v45, %v184_v42  ;;  %v399_v42 = vld [vmem:[#allocation2 + $0x1f8] sm:$0xff]  ;;  %v398_v45 = vld [vmem:[#allocation2 + $0x1f0] sm:$0xff] }
 0x11d   :  { %446 = vmatpush.msrb.mxu0 %v399_v42  ;;  %637 = vmatpush.msrb.mxu2 %v399_v42 }
 0x11e   :  { %v265_v50 = vadd.f32 %v259_v48, %v214_v47  ;;  %v412_v47 = vld [vmem:[#allocation2 + $0x258] sm:$0xff]  ;;  %v397_v48 = vld [vmem:[#allocation2 + $0x1e8] sm:$0xff] }
 0x11f   :  { %447 = vmatpush.msrb.mxu0 %v398_v45  ;;  %638 = vmatpush.msrb.mxu2 %v398_v45 }
 0x120   :  { %v268_v51 = vadd.f32 %v267_v49, %v265_v50  ;;  %v898_v49 = vld [vmem:[#allocation2 + $0x2e8] sm:$0xff] }
 0x121   :  { %448 = vmatpush.msrb.mxu0 %v397_v48  ;;  %639 = vmatpush.msrb.mxu2 %v397_v48  ;;  %v319_v48 = vld [vmem:[%s989_s2] sm:$0x1] }
 0x122   :  { %v269_v52 = vrot.slane %v268_v51, 4 }
 0x124   :  { %v270_v53 = vadd.f32 %v269_v52, %v268_v51  ;;  %v396_v51 = vld [vmem:[#allocation2 + $0x1e0] sm:$0xff] }
 0x125   :  { %v901_v52 = vld [vmem:[#allocation2 + $0x2e0] sm:$0xff]  ;;  %449 = vmatpush.msrb.mxu0 %v396_v51  ;;  %640 = vmatpush.msrb.mxu2 %v396_v51 }
 0x126   :  { %v271_v54 = vrot.slane %v270_v53, 2 }
 0x128   :  { %v272_v55 = vadd.f32 %v271_v54, %v270_v53  ;;  %v410_v53 = vld [vmem:[#allocation2 + $0x248] sm:$0xff]  ;;  %v395_v54 = vld [vmem:[#allocation2 + $0x1d8] sm:$0xff] }
 0x129   :  { %450 = vmatpush.msrb.mxu0 %v395_v54  ;;  %641 = vmatpush.msrb.mxu2 %v395_v54 }
 0x12a   :  { %v273_v56 = vrot.slane %v272_v55, 1 }
 0x12c   :  { %v274_v59 = vadd.f32 %v273_v56, %v272_v55  ;;  %v904_v55 = vld [vmem:[#allocation2 + $0x2d8] sm:$0xff]  ;;  %v409_v56 = vld [vmem:[#allocation2 + $0x240] sm:$0xff] }
 0x12e   :  { %275 = vrot.lane.b32.xlu2 %v274_v59, %s740_s21 }
 0x188   :  { %v276_v60 = vpop.permute.xlu2 %275 }
 0x189   :  { %v277_v62 = vadd.f32 %v276_v60, %v274_v59  ;;  %v394_v59 = vld [vmem:[#allocation2 + $0x1d0] sm:$0xff] }
 0x18a   :  { %v907_v60 = vld [vmem:[#allocation2 + $0x2d0] sm:$0xff]  ;;  %451 = vmatpush.msrb.mxu0 %v394_v59  ;;  %642 = vmatpush.msrb.mxu2 %v394_v59 }
 0x18b   :  { %278 = vrot.lane.b32.xlu0 %v277_v62, %s742_s0 }
 0x1fd   :  { %v279_v0 = vpop.permute.xlu0 %278 }
 0x1fe   :  { %v280_v1 = vadd.f32 %v279_v0, %v277_v62  ;;  %v408_v62 = vld [vmem:[#allocation2 + $0x238] sm:$0xff]  ;;  %v393_v0 = vld [vmem:[#allocation2 + $0x1c8] sm:$0xff] }
 0x1ff   :  { %452 = vmatpush.msrb.mxu0 %v393_v0  ;;  %643 = vmatpush.msrb.mxu2 %v393_v0 }
 0x200   :  { %281 = vrot.lane.b32.xlu1 %v280_v1, %s743_s18 }
 0x272   :  { %v282_v2 = vpop.permute.xlu1 %281 }
 0x273   :  { %v283_v5 = vadd.f32 %v282_v2, %v280_v1  ;;  %v910_v1 = vld [vmem:[#allocation2 + $0x2c8] sm:$0xff]  ;;  %v407_v2 = vld [vmem:[#allocation2 + $0x230] sm:$0xff] }
 0x275   :  { %284 = vrot.lane.b32.xlu2 %v283_v5, %s744_s19 }
 0x2cf   :  { %v285_v6 = vpop.permute.xlu2 %284 }
 0x2d0   :  { %v286_v7 = vadd.f32 %v285_v6, %v283_v5  ;;  %v392_v5 = vld [vmem:[#allocation2 + $0x1c0] sm:$0xff] }
 0x2d1   :  { %v913_v6 = vld [vmem:[#allocation2 + $0x2c0] sm:$0xff]  ;;  %453 = vmatpush.msrb.mxu0 %v392_v5  ;;  %644 = vmatpush.msrb.mxu2 %v392_v5 }
 0x2d2   :  { %v287_v9 = vmul.f32 0.001953125, %v286_v7  ;;  %v406_v7 = vld [vmem:[#allocation2 + $0x228] sm:$0xff] }
 0x2d4   :  { %v288_v10 = vperm.slane %v287_v9, 0  ;;  %v391_v9 = vld [vmem:[#allocation2 + $0x1b8] sm:$0xff] }
 0x2d5   :  { %454 = vmatpush.msrb.mxu0 %v391_v9  ;;  %645 = vmatpush.msrb.mxu2 %v391_v9 }
 0x2d6   :  { %v869_v11 = vsub.f32 %v262_v43, %v288_v10  ;;  %v871_v13 = vsub.f32 %v263_v41, %v288_v10  ;;  %v873_v15 = vsub.f32 %v264_v44, %v288_v10  ;;  %v875_v16 = vsub.f32 %v265_v50, %v288_v10  ;;  %v414_v41 = vld [vmem:[#allocation2 + $0x268] sm:$0xff]  ;;  %v892_v43 = vld [vmem:[#allocation2 + $0x2f8] sm:$0xff]  ;;  %v413_v44 = vld [vmem:[#allocation2 + $0x260] sm:$0xff] }
 0x2d7   :  { %419 = vmatpush.msra.mxu3 %v414_v41  ;;  %492 = vmatpush.msrb.mxu1 %v892_v43  ;;  %v411_v50 = vld [vmem:[#allocation2 + $0x250] sm:$0xff]  ;;  %v916_v10 = vld [vmem:[#allocation2 + $0x2b8] sm:$0xff]  ;;  %v384_v41 = vld [vmem:[#allocation2 + $0x180] sm:$0xff] }
 0x2d8   :  { %v293_v17 = vmul.f32 %v869_v11, %v869_v11  ;;  %v294_v18 = vmul.f32 %v871_v13, %v871_v13  ;;  %v295_v21 = vmul.f32 %v873_v15, %v873_v15  ;;  %v296_v23 = vmul.f32 %v875_v16, %v875_v16 }
 0x2d9   :  { %420 = vmatpush.msra.mxu3 %v413_v44  ;;  %493 = vmatpush.msrb.mxu1 %v895_v46  ;;  %v476_v44 = vld [vmem:[#allocation2 + $0x280] sm:$0xff] }
 0x2da   :  { %v297_v22 = vadd.f32 %v294_v18, %v293_v17  ;;  %v405_v17 = vld [vmem:[#allocation2 + $0x220] sm:$0xff]  ;;  %v390_v18 = vld [vmem:[#allocation2 + $0x1b0] sm:$0xff] }
 0x2db   :  { %421 = vmatpush.msra.mxu3 %v412_v47  ;;  %494 = vmatpush.msrb.mxu1 %v898_v49 }
 0x2dc   :  { %v298_v24 = vadd.f32 %v297_v22, %v295_v21  ;;  %v919_v21 = vld [vmem:[#allocation2 + $0x2b0] sm:$0xff]  ;;  %455 = vmatpush.msrb.mxu0 %v390_v18  ;;  %646 = vmatpush.msrb.mxu2 %v390_v18  ;;  %v404_v22 = vld [vmem:[#allocation2 + $0x218] sm:$0xff] }
 0x2dd   :  { %422 = vmatpush.msra.mxu3 %v411_v50  ;;  %495 = vmatpush.msrb.mxu1 %v901_v52 }
 0x2de   :  { %v299_v25 = vadd.f32 %v298_v24, %v296_v23  ;;  %v389_v23 = vld [vmem:[#allocation2 + $0x1a8] sm:$0xff] }
 0x2df   :  { %423 = vmatpush.msra.mxu3 %v410_v53  ;;  %496 = vmatpush.msrb.mxu1 %v904_v55  ;;  %v921_v24 = vld [vmem:[#allocation2 + $0x2a8] sm:$0xff]  ;;  %v680_v53 = vld [vmem:[%s989_s2 + $0x1] ss:$0 sm:$0xff] }
 0x2e0   :  { %v300_v27 = vrot.slane %v299_v25, 4  ;;  %456 = vmatpush.msrb.mxu0 %v389_v23  ;;  %647 = vmatpush.msrb.mxu2 %v389_v23 }
 0x2e1   :  { %424 = vmatpush.msra.mxu3 %v409_v56  ;;  %497 = vmatpush.msrb.mxu1 %v907_v60 }
 0x2e2   :  { %v301_v28 = vadd.f32 %v300_v27, %v299_v25  ;;  %v403_v25 = vld [vmem:[#allocation2 + $0x210] sm:$0xff]  ;;  %v388_v27 = vld [vmem:[#allocation2 + $0x1a0] sm:$0xff] }
 0x2e3   :  { %425 = vmatpush.msra.mxu3 %v408_v62  ;;  %498 = vmatpush.msrb.mxu1 %v910_v1 }
 0x2e4   :  { %v302_v29 = vrot.slane %v301_v28, 2  ;;  %457 = vmatpush.msrb.mxu0 %v388_v27  ;;  %648 = vmatpush.msrb.mxu2 %v388_v27 }
 0x2e5   :  { %426 = vmatpush.msra.mxu3 %v407_v2  ;;  %499 = vmatpush.msrb.mxu1 %v913_v6 }
 0x2e6   :  { %v303_v30 = vadd.f32 %v302_v29, %v301_v28  ;;  %v480_v28 = vld [vmem:[#allocation2 + $0x2a0] sm:$0xff]  ;;  %v402_v29 = vld [vmem:[#allocation2 + $0x208] sm:$0xff] }
 0x2e7   :  { %427 = vmatpush.msra.mxu3 %v406_v7  ;;  %500 = vmatpush.msrb.mxu1 %v916_v10 }
 0x2e8   :  { %v304_v31 = vrot.slane %v303_v30, 1 }
 0x2e9   :  { %428 = vmatpush.msra.mxu3 %v405_v17  ;;  %501 = vmatpush.msrb.mxu1 %v919_v21 }
 0x2ea   :  { %v305_v32 = vadd.f32 %v304_v31, %v303_v30  ;;  %v387_v30 = vld [vmem:[#allocation2 + $0x198] sm:$0xff] }
 0x2eb   :  { %429 = vmatpush.msra.mxu3 %v404_v22  ;;  %502 = vmatpush.msrb.mxu1 %v921_v24  ;;  %v479_v31 = vld [vmem:[#allocation2 + $0x298] sm:$0xff] }
 0x2ec   :  { %306 = vrot.lane.b32.xlu0 %v305_v32, %s740_s21  ;;  %458 = vmatpush.msrb.mxu0 %v387_v30 }
 0x2ed   :  { %430 = vmatpush.msra.mxu3 %v403_v25  ;;  %503 = vmatpush.msrb.mxu1 %v480_v28 }
 0x2ee   :  { %649 = vmatpush.msrb.mxu2 %v387_v30 }
 0x2ef   :  { %431 = vmatpush.msra.mxu3 %v402_v29  ;;  %504 = vmatpush.msrb.mxu1 %v479_v31 }
 0x35e   :  { %v307_v33 = vpop.permute.xlu0 %306 }
 0x35f   :  { %v308_v34 = vadd.f32 %v307_v33, %v305_v32  ;;  %v401_v32 = vld [vmem:[#allocation2 + $0x200] sm:$0xff] }
 0x360   :  { %432 = vmatpush.msra.mxu3 %v401_v32 }
 0x361   :  { %309 = vrot.lane.b32.xlu1 %v308_v34, %s742_s0 }
 0x362   :  { %653 = vmatpush.msrb.mxu3 %v892_v43 }
 0x364   :  { %654 = vmatpush.msrb.mxu3 %v895_v46 }
 0x366   :  { %655 = vmatpush.msrb.mxu3 %v898_v49 }
 0x368   :  { %656 = vmatpush.msrb.mxu3 %v901_v52 }
 0x36a   :  { %657 = vmatpush.msrb.mxu3 %v904_v55 }
 0x36c   :  { %658 = vmatpush.msrb.mxu3 %v907_v60 }
 0x36e   :  { %659 = vmatpush.msrb.mxu3 %v910_v1 }
 0x370   :  { %660 = vmatpush.msrb.mxu3 %v913_v6 }
 0x372   :  { %661 = vmatpush.msrb.mxu3 %v916_v10 }
 0x374   :  { %662 = vmatpush.msrb.mxu3 %v919_v21 }
 0x376   :  { %663 = vmatpush.msrb.mxu3 %v921_v24 }
 0x378   :  { %664 = vmatpush.msrb.mxu3 %v480_v28 }
 0x37a   :  { %665 = vmatpush.msrb.mxu3 %v479_v31 }
 0x3d3   :  { %v310_v35 = vpop.permute.xlu1 %309 }
 0x3d4   :  { %v311_v36 = vadd.f32 %v310_v35, %v308_v34  ;;  %v386_v35 = vld [vmem:[#allocation2 + $0x190] sm:$0xff] }
 0x3d5   :  { %459 = vmatpush.msrb.mxu0 %v386_v35  ;;  %650 = vmatpush.msrb.mxu2 %v386_v35 }
 0x3d6   :  { %312 = vrot.lane.b32.xlu2 %v311_v36, %s743_s18 }
 0x3d7   :  { %460 = vmatpush.msrb.mxu0 %v385_v39  ;;  %651 = vmatpush.msrb.mxu2 %v385_v39 }
 0x3d9   :  { %461 = vmatpush.msrb.mxu0 %v384_v41  ;;  %652 = vmatpush.msrb.mxu2 %v384_v41 }
 0x430   :  { %v313_v37 = vpop.permute.xlu2 %312 }
 0x431   :  { %v888_v38 = vadd.f32 %v313_v37, %v311_v36  ;;  %v478_v36 = vld [vmem:[#allocation2 + $0x290] sm:$0xff] }
 0x432   :  { %505 = vmatpush.msrb.mxu1 %v478_v36  ;;  %666 = vmatpush.msrb.mxu3 %v478_v36 }
 0x433   :  { %315 = vrot.lane.b32.xlu0 %v888_v38, %s744_s19 }
 0x434   :  { %506 = vmatpush.msrb.mxu1 %v477_v40  ;;  %667 = vmatpush.msrb.mxu3 %v477_v40 }
 0x436   :  { %507 = vmatpush.msrb.mxu1 %v476_v44  ;;  %668 = vmatpush.msrb.mxu3 %v476_v44 }
 0x4a5   :  { %v316_v33 = vpop.permute.xlu0 %315 }
 0x4a6   :  { %v317_v34 = vadd.f32 %v316_v33, %v888_v38 }
 0x4a8   :  { %v318_v37 = vmul.f32 0.001953125, %v317_v34 }
 0x4aa   :  { %v321_v42 = vadd.f32 1e-05, %v318_v37 }
 0x4ac   :  { %682 = vrsqrt.f32 %v321_v42  ;;  %vm328_vm3 = vweird.f32 %v321_v42 }
 0x4b2   :  { %v683_v38 = vpop.eup %682 }
 0x4b3   :  { %v323_v43 = vmul.f32 %v683_v38, %v321_v42  ;;  %vm329_vm2 = vweird.f32 %v683_v38 }
 0x4b4   :  { %vm330_vm4 = vmor %vm328_vm3, %vm329_vm2 }
 0x4b5   :  { %v324_v45 = vmul.f32 %v683_v38, %v323_v43 }
 0x4b7   :  { %v325_v47 = vmul.f32 0.5, %v324_v45 }
 0x4b9   :  { %v326_v46 = vsub.f32 1.5, %v325_v47 }
 0x4bb   :  { %v327_v49 = vmul.f32 %v683_v38, %v326_v46 }
 0x4bd   :  { %v331_v50 = vsel %vm330_vm4, %v683_v38, %v327_v49 }
 0x4be   :  { %v332_v51 = vmul.f32 %v331_v50, %v319_v48 }
 0x4c0   :  { %v333_v52 = vperm.slane %v332_v51, 0 }
 0x4c2   :  { %v334_v54 = vmul.f32 %v333_v52, %v869_v11  ;;  %v335_v55 = vmul.f32 %v333_v52, %v871_v13  ;;  %v336_v56 = vmul.f32 %v333_v52, %v873_v15  ;;  %v337_v59 = vmul.f32 %v333_v52, %v875_v16 }
 0x4c4   :  { %v339_v60 = vadd.f32 %v680_v53, %v334_v54  ;;  %v340_v62 = vadd.f32 %v680_v53, %v335_v55  ;;  %v341_v0 = vadd.f32 %v680_v53, %v336_v56  ;;  %v342_v1 = vadd.f32 %v680_v53, %v337_v59 }
 0x4c6   :  { %v343_v2 = vmax.f32 %v339_v60, 0.0  ;;  %v344_v5 = vmax.f32 %v340_v62, 0.0  ;;  %v345_v6 = vmax.f32 %v341_v0, 0.0  ;;  %v346_v7 = vmax.f32 %v342_v1, 0.0 }
 0x4c8   :  { %v367_v9 = vrot.slane %v343_v2, 1  ;;  %433 = vmatmul.f32.vlgmr.msra.gmra.mxu3 %v343_v2  ;;  %v351_v11 = vrot.slane %v343_v2, 7  ;;  %v352_v10 = vrot.slane %v344_v5, 7  ;;  %v354_v13 = vrot.slane %v345_v6, 7 }
 0x4c9   :  { %v368_v17 = vrot.slane %v344_v5, 1  ;;  %v356_v24 = vrot.slane %v346_v7, 7  ;;  %v370_v25 = vrot.slane %v345_v6, 1 }
 0x4ca   :  { %v362_v15 = vsel %vm51_vm1, 0.0, %v351_v11  ;;  %v355_v16 = vsel %vm51_vm1, %v352_v10, %v354_v13  ;;  %v353_v27 = vsel %vm51_vm1, %v351_v11, %v352_v10 }
 0x4cb   :  { %v363_v18 = vmul.f32 %v362_v15, %v838_v8  ;;  %v365_v21 = vmul.f32 %v355_v16, %v852_v19  ;;  %v369_v22 = vsel %vm88_vm0, %v367_v9, %v368_v17  ;;  %v357_v28 = vsel %vm51_vm1, %v354_v13, %v356_v24 }
 0x4cc   :  { %v379_v23 = vmul.f32 %v369_v22, %v822_v63  ;;  %v371_v29 = vsel %vm88_vm0, %v368_v17, %v370_v25  ;;  %v364_v8 = vmul.f32 %v353_v27, %v846_v14  ;;  %v366_v19 = vmul.f32 %v357_v28, %v861_v26 }
 0x4cd   :  { %462 = vmatmul.f32.vlgmr.msrb.gmra.mxu0 %v363_v18  ;;  %468 = vmatmul.f32.vlgmr.msrb.gmra.mxu2 %v365_v21  ;;  %v380_v30 = vmul.f32 %v371_v29, %v833_v4  ;;  %v372_v63 = vrot.slane %v346_v7, 1 }
 0x4ce   :  { %508 = vmatmul.f32.vlgmr.msrb.gmra.mxu1 %v379_v23 }
 0x4cf   :  { %v373_v31 = vsel %vm88_vm0, %v370_v25, %v372_v63  ;;  %v378_v33 = vsel %vm88_vm0, %v372_v63, 0.0 }
 0x4d0   :  { %436 = vmatmul.f32.gmra.mxu3 %v344_v5  ;;  %v381_v32 = vmul.f32 %v373_v31, %v843_v12  ;;  %v382_v34 = vmul.f32 %v378_v33, %v854_v20 }
 0x4d5   :  { %465 = vmatmul.f32.gmra.mxu0 %v364_v8  ;;  %471 = vmatmul.f32.gmra.mxu2 %v366_v19 }
 0x4d6   :  { %511 = vmatmul.f32.gmra.mxu1 %v380_v30 }
 0x4d8   :  { %439 = vmatmul.f32.gmra.mxu3 %v345_v6 }
 0x4e0   :  { %442 = vmatmul.f32.gmra.mxu3 %v346_v7 }
 0x4e8   :  { %514 = vmatmul.f32.vlgmr.msrb.gmra.mxu3 %v381_v32 }
 0x4f0   :  { %517 = vmatmul.f32.gmra.mxu3 %v382_v34 }
 0x54a   :  { %v463_v4 = vpop.f32.mrf.mxu0 }
 0x54b   :  { %v434_v14 = vpop.f32.mrf.mxu3  ;;  %v509_v36 = vpop.f32.mrf.mxu1 }
 0x54c   :  { %v464_v44 = vadd.f32 %v463_v4, %v434_v14 }
 0x54e   :  { %v521_v45 = vadd.f32 %v509_v36, %v464_v44 }
 0x550   :  { %v469_v39 = vpop.f32.mrf.mxu2 }
 0x552   :  { %v466_v40 = vpop.f32.mrf.mxu0 }
 0x553   :  { %v437_v26 = vpop.f32.mrf.mxu3  ;;  %v512_v38 = vpop.f32.mrf.mxu1 }
 0x554   :  { %v467_v41 = vadd.f32 %v466_v40, %v437_v26 }
 0x556   :  { %v522_v43 = vadd.f32 %v512_v38, %v467_v41  ;;  %v578_v38 = vld [vmem:[%s989_s2 + $0x2] sm:$0x1] }
 0x558   :  { %v472_v46 = vpop.f32.mrf.mxu2  ;;  %v525_v20 = vadd.f32 %v522_v43, %v521_v45 }
 0x55b   :  { %v440_v35 = vpop.f32.mrf.mxu3 }
 0x55c   :  { %v470_v12 = vadd.f32 %v469_v39, %v440_v35 }
 0x563   :  { %v443_v37 = vpop.f32.mrf.mxu3 }
 0x564   :  { %v473_v48 = vadd.f32 %v472_v46, %v443_v37  ;;  %v681_v46 = vld [vmem:[%s989_s2 + $0x3] ss:$0 sm:$0xff]  ;;  %s745_s2 = smov [#allocation5]  }
 0x565   :  { %s618_s29 = sshll.u32 %s745_s2, 4  ;;  %s619_s29 = int_to_ptr.vmem [resolvable:$true] %s618_s29 }
 0x56b   :  { %v515_v42 = vpop.f32.mrf.mxu3 }
 0x56c   :  { %v523_v47 = vadd.f32 %v515_v42, %v470_v12 }
 0x56e   :  { %v526_v50 = vadd.f32 %v525_v20, %v523_v47 }
 0x573   :  { %v518_v49 = vpop.f32.mrf.mxu3 }
 0x574   :  { %v524_v51 = vadd.f32 %v518_v49, %v473_v48 }
 0x576   :  { %v527_v52 = vadd.f32 %v526_v50, %v524_v51 }
 0x578   :  { %v528_v53 = vrot.slane %v527_v52, 4 }
 0x57a   :  { %v529_v54 = vadd.f32 %v528_v53, %v527_v52 }
 0x57c   :  { %v530_v55 = vrot.slane %v529_v54, 2 }
 0x57e   :  { %v531_v56 = vadd.f32 %v530_v55, %v529_v54 }
 0x580   :  { %v532_v59 = vrot.slane %v531_v56, 1 }
 0x582   :  { %v533_v60 = vadd.f32 %v532_v59, %v531_v56 }
 0x584   :  { %534 = vrot.lane.b32.xlu1 %v533_v60, %s740_s21 }
 0x5f6   :  { %v535_v62 = vpop.permute.xlu1 %534 }
 0x5f7   :  { %v536_v0 = vadd.f32 %v535_v62, %v533_v60 }
 0x5f9   :  { %537 = vrot.lane.b32.xlu2 %v536_v0, %s742_s0 }
 0x653   :  { %v538_v1 = vpop.permute.xlu2 %537 }
 0x654   :  { %v539_v2 = vadd.f32 %v538_v1, %v536_v0 }
 0x656   :  { %540 = vrot.lane.b32.xlu0 %v539_v2, %s743_s18 }
 0x6c8   :  { %v541_v5 = vpop.permute.xlu0 %540 }
 0x6c9   :  { %v542_v6 = vadd.f32 %v541_v5, %v539_v2 }
 0x6cb   :  { %543 = vrot.lane.b32.xlu1 %v542_v6, %s744_s19 }
 0x73d   :  { %v544_v7 = vpop.permute.xlu1 %543 }
 0x73e   :  { %v545_v9 = vadd.f32 %v544_v7, %v542_v6 }
 0x740   :  { %v546_v11 = vmul.f32 0.001953125, %v545_v9 }
 0x742   :  { %v547_v10 = vperm.slane %v546_v11, 0 }
 0x744   :  { %v548_v13 = vsub.f32 %v521_v45, %v547_v10  ;;  %v549_v17 = vsub.f32 %v522_v43, %v547_v10  ;;  %v550_v15 = vsub.f32 %v523_v47, %v547_v10  ;;  %v551_v16 = vsub.f32 %v524_v51, %v547_v10 }
 0x746   :  { %v552_v18 = vmul.f32 %v548_v13, %v548_v13  ;;  %v553_v21 = vmul.f32 %v549_v17, %v549_v17  ;;  %v554_v22 = vmul.f32 %v550_v15, %v550_v15  ;;  %v555_v24 = vmul.f32 %v551_v16, %v551_v16 }
 0x748   :  { %v556_v23 = vadd.f32 %v553_v21, %v552_v18 }
 0x74a   :  { %v557_v25 = vadd.f32 %v556_v23, %v554_v22 }
 0x74c   :  { %v558_v27 = vadd.f32 %v557_v25, %v555_v24 }
 0x74e   :  { %v559_v28 = vrot.slane %v558_v27, 4 }
 0x750   :  { %v560_v29 = vadd.f32 %v559_v28, %v558_v27 }
 0x752   :  { %v561_v8 = vrot.slane %v560_v29, 2 }
 0x754   :  { %v562_v19 = vadd.f32 %v561_v8, %v560_v29 }
 0x756   :  { %v563_v30 = vrot.slane %v562_v19, 1 }
 0x758   :  { %v564_v63 = vadd.f32 %v563_v30, %v562_v19 }
 0x75a   :  { %565 = vrot.lane.b32.xlu2 %v564_v63, %s740_s21 }
 0x7b4   :  { %v566_v31 = vpop.permute.xlu2 %565 }
 0x7b5   :  { %v567_v32 = vadd.f32 %v566_v31, %v564_v63 }
 0x7b7   :  { %568 = vrot.lane.b32.xlu0 %v567_v32, %s742_s0 }
 0x829   :  { %v569_v33 = vpop.permute.xlu0 %568 }
 0x82a   :  { %v570_v34 = vadd.f32 %v569_v33, %v567_v32 }
 0x82c   :  { %571 = vrot.lane.b32.xlu1 %v570_v34, %s743_s18 }
 0x89e   :  { %v572_v14 = vpop.permute.xlu1 %571 }
 0x89f   :  { %v573_v26 = vadd.f32 %v572_v14, %v570_v34 }
 0x8a1   :  { %574 = vrot.lane.b32.xlu2 %v573_v26, %s744_s19 }
 0x8fb   :  { %v575_v35 = vpop.permute.xlu2 %574 }
 0x8fc   :  { %v576_v4 = vadd.f32 %v575_v35, %v573_v26 }
 0x8fe   :  { %v577_v36 = vmul.f32 0.001953125, %v576_v4 }
 0x900   :  { %v580_v37 = vadd.f32 1e-05, %v577_v36 }
 0x902   :  { %684 = vrsqrt.f32 %v580_v37  ;;  %vm587_vm6 = vweird.f32 %v580_v37 }
 0x908   :  { %v685_v39 = vpop.eup %684 }
 0x909   :  { %v582_v40 = vmul.f32 %v685_v39, %v580_v37  ;;  %vm588_vm5 = vweird.f32 %v685_v39 }
 0x90a   :  { %vm589_vm7 = vmor %vm587_vm6, %vm588_vm5 }
 0x90b   :  { %v583_v41 = vmul.f32 %v685_v39, %v582_v40 }
 0x90d   :  { %v584_v42 = vmul.f32 0.5, %v583_v41 }
 0x90f   :  { %v585_v44 = vsub.f32 1.5, %v584_v42 }
 0x911   :  { %v586_v43 = vmul.f32 %v685_v39, %v585_v44 }
 0x913   :  { %v590_v12 = vsel %vm589_vm7, %v685_v39, %v586_v43 }
 0x914   :  { %v591_v45 = vmul.f32 %v590_v12, %v578_v38 }
 0x916   :  { %v592_v47 = vperm.slane %v591_v45, 0 }
 0x918   :  { %v593_v48 = vmul.f32 %v592_v47, %v548_v13  ;;  %v594_v20 = vmul.f32 %v592_v47, %v549_v17  ;;  %v595_v49 = vmul.f32 %v592_v47, %v550_v15  ;;  %v596_v50 = vmul.f32 %v592_v47, %v551_v16 }
 0x91a   :  { %v598_v51 = vadd.f32 %v681_v46, %v593_v48  ;;  %v599_v52 = vadd.f32 %v681_v46, %v594_v20  ;;  %v600_v53 = vadd.f32 %v681_v46, %v595_v49  ;;  %v601_v54 = vadd.f32 %v681_v46, %v596_v50 }
 0x91c   :  { %v602_v55 = vadd.f32 %v598_v51, %v804_v57  ;;  %v603_v56 = vadd.f32 %v599_v52, %v810_v58  ;;  %v604_v59 = vadd.f32 %v600_v53, %v818_v61  ;;  %v605_v60 = vadd.f32 %v601_v54, %v830_v3 }
 0x91e   :  { %v606_v62 = vmax.f32 %v602_v55, 0.0  ;;  %v607_v0 = vmax.f32 %v603_v56, 0.0  ;;  %v608_v1 = vmax.f32 %v604_v59, 0.0  ;;  %v609_v2 = vmax.f32 %v605_v60, 0.0 }
 0x920   :  { %610 = vst [vmem:[#allocation5] sm:$0xff] %v606_v62 }
 0x921   :  { %611 = vst [vmem:[#allocation5 + $0x8] sm:$0xff] %v607_v0 }
 0x922   :  { %612 = vst [vmem:[#allocation5 + $0x10] sm:$0xff] %v608_v1 }
 0x923   :  { %613 = vst [vmem:[#allocation5 + $0x18] sm:$0xff] %v609_v2 }
 0x924   :  { %626 = dma.vmem_to_hbm [thread:$0]  %s619_s29, 512, %s621_s6, [#allocation4], %s739_s20, %s739_s20, %s740_s21  }
 0x925   :  { %736 = dma.done.wait [#allocation4], 512  }
 0x926   :  { %737 = vsyncadd [#allocation4], 4294966784 }
 0x927   :  { %631 = vsyncpa [#allocation3], 1 }
 0x928   :  { %632 = vsyncpa [#allocation4], 1 }

</bundles_post_ra>
